<compile_context>
chip_gen: v7x
topology: tpu7x:2x2x1
jax: 0.10.0
libtpu: 0.0.40
codegen_flags: <defaults>
</compile_context>

<pallas_src>
import functools
import math

import jax
import jax.numpy as jnp
from jax import lax
from jax.experimental import pallas as pl
from jax.experimental.pallas import tpu as pltpu


def _nwj_pair_kernel(hx_ref, hyb_ref, w2_ref, lse_ref, m_sc, l_sc, *,
                     mi, cj, compute_dtype):
    """Pairwise critic + online logsumexp over the j (x-row) axis.

    hx_ref : [BN, H]  (x @ W1x) tile for this j step
    hyb_ref: [BM, H]  (y @ W1y + b1) tile for this i step
    w2_ref : [1, H]   second-layer weight (transposed row)
    lse_ref: [BM, 1]  out: logsumexp_j of the raw critic scores
                      (b2 and the "-1" are folded in by the wrapper)
    m_sc, l_sc: [BM, 1] running max / rescaled sum (persist across j steps)

    Static params:
      mi, cj        : i-rows / j-rows per register-sized inner unit (<= 8 each)
      compute_dtype : dtype for the pairwise add/ReLU/mul (f32, or bf16 on
                      v6e/v7x); accumulation and LSE state stay f32.
    """
    j = pl.program_id(1)

    block_m, H = hyb_ref.shape
    block_n = hx_ref.shape[0]
    # H is reduced in 128-lane blocks: VALU partial sums into one [mi, cj, 128]
    # accumulator, then a single cross-lane (XLU) reduce per unit — keeps the
    # XLU off the critical path (2 XLU units on v6e/v7x).
    hb = 128 if H % 128 == 0 else H
    nhb = H // hb
    n_isub = block_m // mi
    n_jchunk = block_n // cj

    @pl.when(j == 0)
    def _init():
        m_sc[...] = jnp.full(m_sc.shape, -jnp.inf, dtype=m_sc.dtype)
        l_sc[...] = jnp.zeros(l_sc.shape, dtype=l_sc.dtype)

    # Hoist w2 (and its sublane broadcast over the cj axis) out of all loops:
    # JAX does not CSE broadcast_in_dim, so doing this per-iteration would
    # re-materialize it every step.
    w2v = w2_ref[...].astype(compute_dtype)                           # [1, H]
    w2_blk = [jnp.broadcast_to(w2v[:, k * hb:(k + 1) * hb], (cj, hb))
              for k in range(nhb)]

    # Partial-unroll factor for the inner j loop (LLO scheduler visibility).
    j_unroll = (n_jchunk if n_jchunk <= 8
                else next(d for d in (8, 4, 2, 1) if n_jchunk % d == 0))

    def i_body(i_sub, carry_i):
        i0 = pl.multiple_of(i_sub * mi, mi)
        hyb_s = hyb_ref[pl.ds(i0, mi), :].astype(compute_dtype)       # [mi, H]
        m0 = m_sc[pl.ds(i0, mi), :]                                   # [mi, 1]
        l0 = l_sc[pl.ds(i0, mi), :]                                   # [mi, 1]

        def j_body(jc, carry):
            m_prev, l_prev = carry
            j0 = pl.multiple_of(jc * cj, cj)
            hx_c = hx_ref[pl.ds(j0, cj), :].astype(compute_dtype)     # [cj, H]

            # Pairwise critic scores for this [mi, cj] unit, H reduced in
            # 128-lane blocks; everything stays in vregs (no VMEM temp).
            acc = jnp.zeros((mi, cj, hb), jnp.float32)
            for k in range(nhb):
                a = hyb_s[:, k * hb:(k + 1) * hb]                     # [mi, hb]
                b = hx_c[:, k * hb:(k + 1) * hb]                      # [cj, hb]
                s = jnp.maximum(a[:, None, :] + b[None, :, :], 0.0)   # [mi,cj,hb]
                acc = acc + (s * w2_blk[k][None, :, :]).astype(jnp.float32)
            t = jnp.sum(acc, axis=-1)                                 # [mi, cj]

            # Online (flash-style) logsumexp update over the j axis.
            m_new = jnp.maximum(m_prev, jnp.max(t, axis=-1, keepdims=True))
            alpha = jnp.exp(m_prev - m_new)
            l_new = alpha * l_prev + jnp.sum(jnp.exp(t - m_new), axis=-1,
                                             keepdims=True)
            return m_new, l_new

        m_f, l_f = lax.fori_loop(0, n_jchunk, j_body, (m0, l0),
                                 unroll=j_unroll)
        m_sc[pl.ds(i0, mi), :] = m_f
        l_sc[pl.ds(i0, mi), :] = l_f
        return carry_i

    lax.fori_loop(0, n_isub, i_body, 0)

    @pl.when(j == pl.num_programs(1) - 1)
    def _finalize():
        lse_ref[...] = m_sc[...] + jnp.log(l_sc[...])


def nwj_forward(x, y, w1, b1, w2, b2, *, block_m=256, block_n=2048,
                compute_dtype=jnp.float32):
    """NWJ lower bound.  x: [N, Dx], y: [N, Dy], float32.

    VMEM per grid step (double-buffered inputs, f32):
        2*block_n*H*4 (hx) + 2*block_m*H*4 (hyb) + O(block_m) scratch.
    Defaults (block_m=256, block_n<=2048, H=768) need ~14 MiB: fits v5e's
    16 MiB scoped default and leaves wide headroom on v6e (128 MiB physical)
    and v7x (64 MiB physical); an explicit vmem_limit_bytes with 16 MiB of
    headroom is passed regardless.  When N <= block_n, hx is fetched from HBM
    exactly once and stays VMEM-resident across the whole grid.
    """
    N, x_dim = x.shape
    _, y_dim = y.shape
    H = w1.shape[1]
    assert w1.shape == (x_dim + y_dim, H)
    assert w2.shape[0] == H

    block_m = min(block_m, N)
    block_n = min(block_n, N)
    # Keep >= 2 i-blocks when possible so the "parallel" i axis can actually
    # split across v7x's two TensorCores.
    if N // block_m < 2 and N % 2 == 0 and (N // 2) % 8 == 0:
        block_m = N // 2
    # TODO(synk): pad (with -inf-scoring rows) or add a masked tail path for N
    # not divisible by the block sizes.
    assert N % block_m == 0 and N % block_n == 0, (N, block_m, block_n)

    mi = math.gcd(block_m, 8)     # i-rows per inner unit (sublane-friendly)
    cj = math.gcd(block_n, 8)     # j-rows per inner unit

    # --- cheap glue hoisted out of the O(N^2) kernel (plain JAX / XLA) ------
    w1x = w1[:x_dim]                                        # [Dx, H]
    w1y = w1[x_dim:]                                        # [Dy, H]
    hx = (x @ w1x).astype(jnp.float32)                      # [N, H]
    hyb = (y @ w1y + b1.reshape(1, H)).astype(jnp.float32)  # [N, H], b1 folded

    # T0 diagonal (matched pairs) is only O(N*H): compute it outside.
    t0 = jnp.maximum(hx + hyb, 0.0) @ w2.reshape(H, 1) + b2.reshape(1, 1)

    w2t = w2.reshape(1, H).astype(jnp.float32)

    # --- pairwise kernel ----------------------------------------------------
    grid = (N // block_m, N // block_n)   # (i: y rows, j: x rows = reduction)
    vmem_need = 4 * (2 * block_n * H + 2 * block_m * H + 6 * block_m + 2 * H)
    kernel = functools.partial(_nwj_pair_kernel, mi=mi, cj=cj,
                               compute_dtype=compute_dtype)
    lse_raw = pl.pallas_call(
        kernel,
        out_shape=jax.ShapeDtypeStruct((N, 1), jnp.float32),
        grid_spec=pltpu.PrefetchScalarGridSpec(
            num_scalar_prefetch=0,
            grid=grid,
            in_specs=[
                pl.BlockSpec((block_n, H), lambda i, j: (j, 0)),   # hx  (j tile)
                pl.BlockSpec((block_m, H), lambda i, j: (i, 0)),   # hyb (i tile)
                pl.BlockSpec((1, H), lambda i, j: (0, 0)),         # w2^T
            ],
            out_specs=pl.BlockSpec((block_m, 1), lambda i, j: (i, 0)),
            scratch_shapes=[pltpu.VMEM((block_m, 1), jnp.float32),   # running max
                            pltpu.VMEM((block_m, 1), jnp.float32)],  # running sum
        ),
        compiler_params=pltpu.CompilerParams(
            dimension_semantics=("parallel", "arbitrary"),
            vmem_limit_bytes=int(vmem_need) + (16 << 20)),
    )(hx, hyb, w2t)

    # logsumexp_j(T1[i, :]) = lse_raw[i] + b2 - 1 ;  ee = exp(lse - log N)
    ee = jnp.exp(lse_raw + (b2.reshape(1, 1) - 1.0) - math.log(N))
    return jnp.mean(t0) - jnp.mean(ee)


def nwj_reference(x, y, w1, b1, w2, b2):
    """Pure-JAX reference matching the PyTorch forward exactly."""
    N = y.shape[0]

    def F(z):
        h = jnp.maximum(z @ w1 + b1, 0.0)
        return h @ w2 + b2

    T0 = F(jnp.concatenate([x, y], axis=-1))                               # [N, 1]
    x_tile = jnp.broadcast_to(x[None, :, :], (N, N, x.shape[1]))
    y_tile = jnp.broadcast_to(y[:, None, :], (N, N, y.shape[1]))
    T1 = F(jnp.concatenate([x_tile, y_tile], axis=-1)) - 1.0               # [N, N, 1]
    lse = jax.scipy.special.logsumexp(T1, axis=1)                          # [N, 1]
    return T0.mean() - jnp.exp(lse - jnp.log(jnp.float32(N))).mean()


if __name__ == "__main__":
    key = jax.random.PRNGKey(0)
    # Small stand-in for hidden_size=768; H=256 exercises the blocked-H loop.
    N, x_dim, y_dim, H = 32, 16, 16, 256
    kx, ky, kw1, kb1, kw2, kb2 = jax.random.split(key, 6)

    x = jax.random.normal(kx, (N, x_dim), jnp.float32)
    y = jax.random.normal(ky, (N, y_dim), jnp.float32)

    # nn.Linear-style init: U(-1/sqrt(fan_in), 1/sqrt(fan_in)).
    bound1 = 1.0 / math.sqrt(x_dim + y_dim)
    w1 = jax.random.uniform(kw1, (x_dim + y_dim, H), jnp.float32, -bound1, bound1)
    b1 = jax.random.uniform(kb1, (H,), jnp.float32, -bound1, bound1)
    bound2 = 1.0 / math.sqrt(H)
    w2 = jax.random.uniform(kw2, (H, 1), jnp.float32, -bound2, bound2)
    b2 = jax.random.uniform(kb2, (1,), jnp.float32, -bound2, bound2)

    # Small blocks so the (2, 2) grid exercises the cross-step online-LSE path,
    # the i-sub loop (2 trips), the j-chunk loop (2 trips) and 2 H blocks.
    lb = nwj_forward(x, y, w1, b1, w2, b2, block_m=16, block_n=16)
    lb = jax.block_until_ready(lb)

    ref = nwj_reference(x, y, w1, b1, w2, b2)
    assert jnp.allclose(lb, ref, atol=1e-4, rtol=1e-4), (lb, ref)
    print("KERNEL_OK")
</pallas_src>

<mosaic_0001>
module attributes {stable_mosaic.version = 11 : i64} {
  func.func @_nwj_pair_kernel(%arg0: i32, %arg1: i32, %arg2: memref<16x256xf32, #tpu.memory_space<vmem>>, %arg3: memref<16x256xf32, #tpu.memory_space<vmem>>, %arg4: memref<1x256xf32, #tpu.memory_space<vmem>>, %arg5: memref<16x1xf32, #tpu.memory_space<vmem>>, %arg6: memref<16x1xf32, #tpu.memory_space<vmem>>, %arg7: memref<16x1xf32, #tpu.memory_space<vmem>>) attributes {dimension_semantics = [#tpu.dimension_semantics<parallel>, #tpu.dimension_semantics<arbitrary>], iteration_bounds = array<i64: 2, 2>, scalar_prefetch = 0 : i64, scratch_operands = 2 : i64, tpu.core_type = #tpu.core_type<tc>, window_params = [{transform_indices = @transform_0, window_bounds = array<i64: 16, 256>}, {transform_indices = @transform_1, window_bounds = array<i64: 16, 256>}, {pipeline_mode = #tpu.pipeline_mode<synchronous>, transform_indices = @transform_2, window_bounds = array<i64: 1, 256>}, {transform_indices = @transform_3, window_bounds = array<i64: 16, 1>}]} {
    %c0_i32 = arith.constant 0 : i32
    %0 = arith.cmpi eq, %arg1, %c0_i32 : i32
    %1 = arith.extui %0 : i1 to i32
    %c0_i32_0 = arith.constant 0 : i32
    %2 = arith.cmpi ne, %1, %c0_i32_0 : i32
    scf.if %2 {
      %cst = arith.constant 0xFF800000 : f32
      %14 = vector.broadcast %cst : f32 to vector<16x1xf32>
      %c0_6 = arith.constant 0 : index
      %c0_7 = arith.constant 0 : index
      %15 = vector.load %arg6[%c0_6, %c0_7] : memref<16x1xf32, #tpu.memory_space<vmem>>, vector<16x1xf32>
      tpu.vector_store %arg6[%c0_6, %c0_7], %14 {strides = array<i32>} : memref<16x1xf32, #tpu.memory_space<vmem>>, vector<16x1xf32>,
      %cst_8 = arith.constant 0.000000e+00 : f32
      %16 = vector.broadcast %cst_8 : f32 to vector<16x1xf32>
      %c0_9 = arith.constant 0 : index
      %c0_10 = arith.constant 0 : index
      %17 = vector.load %arg7[%c0_9, %c0_10] : memref<16x1xf32, #tpu.memory_space<vmem>>, vector<16x1xf32>
      tpu.vector_store %arg7[%c0_9, %c0_10], %16 {strides = array<i32>} : memref<16x1xf32, #tpu.memory_space<vmem>>, vector<16x1xf32>,
    } else {
    }
    %c0 = arith.constant 0 : index
    %c0_1 = arith.constant 0 : index
    %3 = vector.load %arg4[%c0, %c0_1] : memref<1x256xf32, #tpu.memory_space<vmem>>, vector<1x256xf32>
    %4 = vector.extract_strided_slice %3 {offsets = [0, 0], sizes = [1, 128], strides = [1, 1]} : vector<1x256xf32> to vector<1x128xf32>
    %5 = vector.shape_cast %4 : vector<1x128xf32> to vector<1x128xf32>
    %6 = vector.broadcast %5 : vector<1x128xf32> to vector<8x128xf32>
    %7 = vector.extract_strided_slice %3 {offsets = [0, 128], sizes = [1, 128], strides = [1, 1]} : vector<1x256xf32> to vector<1x128xf32>
    %8 = vector.shape_cast %7 : vector<1x128xf32> to vector<1x128xf32>
    %9 = vector.broadcast %8 : vector<1x128xf32> to vector<8x128xf32>
    %c0_i32_2 = arith.constant 0 : i32
    %c2_i32 = arith.constant 2 : i32
    %10 = arith.addi %c0_i32_2, %c2_i32 : i32
    %c1_i32 = arith.constant 1 : i32
    scf.for %arg8 = %c0_i32_2 to %10 step %c1_i32  : i32 {
      %c8_i32 = arith.constant 8 : i32
      %14 = arith.muli %arg8, %c8_i32 : i32
      %15 = tpu.assume_multiple %14, 8 : i32
      %16 = arith.index_cast %15 : i32 to index
      %c0_6 = arith.constant 0 : index
      %17 = vector.load %arg3[%16, %c0_6] : memref<16x256xf32, #tpu.memory_space<vmem>>, vector<8x256xf32>
      %18 = arith.index_cast %15 : i32 to index
      %c0_7 = arith.constant 0 : index
      %19 = vector.load %arg6[%18, %c0_7] : memref<16x1xf32, #tpu.memory_space<vmem>>, vector<8x1xf32>
      %20 = arith.index_cast %15 : i32 to index
      %c0_8 = arith.constant 0 : index
      %21 = vector.load %arg7[%20, %c0_8] : memref<16x1xf32, #tpu.memory_space<vmem>>, vector<8x1xf32>
      %c0_i32_9 = arith.constant 0 : i32
      %c8_i32_10 = arith.constant 8 : i32
      %22 = arith.muli %c0_i32_9, %c8_i32_10 : i32
      %23 = tpu.assume_multiple %22, 8 : i32
      %24 = arith.index_cast %23 : i32 to index
      %c0_11 = arith.constant 0 : index
      %25 = vector.load %arg2[%24, %c0_11] : memref<16x256xf32, #tpu.memory_space<vmem>>, vector<8x256xf32>
      %cst = arith.constant 0.000000e+00 : f32
      %26 = vector.broadcast %cst : f32 to vector<8x8x128xf32>
      %27 = vector.extract_strided_slice %17 {offsets = [0, 0], sizes = [8, 128], strides = [1, 1]} : vector<8x256xf32> to vector<8x128xf32>
      %28 = vector.extract_strided_slice %25 {offsets = [0, 0], sizes = [8, 128], strides = [1, 1]} : vector<8x256xf32> to vector<8x128xf32>
      %29 = vector.shape_cast %27 : vector<8x128xf32> to vector<8x1x128xf32>
      %30 = vector.shape_cast %28 : vector<8x128xf32> to vector<1x8x128xf32>
      %31 = vector.broadcast %29 : vector<8x1x128xf32> to vector<8x8x128xf32>
      %32 = vector.broadcast %30 : vector<1x8x128xf32> to vector<8x8x128xf32>
      %33 = arith.addf %31, %32 : vector<8x8x128xf32>
      %cst_12 = arith.constant 0.000000e+00 : f32
      %34 = vector.broadcast %cst_12 : f32 to vector<8x8x128xf32>
      %35 = arith.maximumf %33, %34 : vector<8x8x128xf32>
      %36 = vector.shape_cast %6 : vector<8x128xf32> to vector<1x8x128xf32>
      %37 = vector.broadcast %36 : vector<1x8x128xf32> to vector<8x8x128xf32>
      %38 = arith.mulf %35, %37 : vector<8x8x128xf32>
      %39 = arith.addf %26, %38 : vector<8x8x128xf32>
      %40 = vector.extract_strided_slice %17 {offsets = [0, 128], sizes = [8, 128], strides = [1, 1]} : vector<8x256xf32> to vector<8x128xf32>
      %41 = vector.extract_strided_slice %25 {offsets = [0, 128], sizes = [8, 128], strides = [1, 1]} : vector<8x256xf32> to vector<8x128xf32>
      %42 = vector.shape_cast %40 : vector<8x128xf32> to vector<8x1x128xf32>
      %43 = vector.shape_cast %41 : vector<8x128xf32> to vector<1x8x128xf32>
      %44 = vector.broadcast %42 : vector<8x1x128xf32> to vector<8x8x128xf32>
      %45 = vector.broadcast %43 : vector<1x8x128xf32> to vector<8x8x128xf32>
      %46 = arith.addf %44, %45 : vector<8x8x128xf32>
      %cst_13 = arith.constant 0.000000e+00 : f32
      %47 = vector.broadcast %cst_13 : f32 to vector<8x8x128xf32>
      %48 = arith.maximumf %46, %47 : vector<8x8x128xf32>
      %49 = vector.shape_cast %9 : vector<8x128xf32> to vector<1x8x128xf32>
      %50 = vector.broadcast %49 : vector<1x8x128xf32> to vector<8x8x128xf32>
      %51 = arith.mulf %48, %50 : vector<8x8x128xf32>
      %52 = arith.addf %39, %51 : vector<8x8x128xf32>
      %cst_14 = arith.constant dense<0.000000e+00> : vector<8x8xf32>
      %53 = vector.multi_reduction <add>, %52, %cst_14 [2] : vector<8x8x128xf32> to vector<8x8xf32>
      %cst_15 = arith.constant dense<0xFF800000> : vector<8xf32>
      %54 = vector.multi_reduction <maximumf>, %53, %cst_15 [1] : vector<8x8xf32> to vector<8xf32>
      %55 = vector.shape_cast %54 : vector<8xf32> to vector<8x1xf32>
      %56 = arith.maximumf %19, %55 : vector<8x1xf32>
      %57 = arith.subf %19, %56 : vector<8x1xf32>
      %58 = math.exp %57 : vector<8x1xf32>
      %59 = arith.mulf %58, %21 : vector<8x1xf32>
      %60 = vector.broadcast %56 : vector<8x1xf32> to vector<8x8xf32>
      %61 = arith.subf %53, %60 : vector<8x8xf32>
      %62 = math.exp %61 : vector<8x8xf32>
      %cst_16 = arith.constant dense<0.000000e+00> : vector<8xf32>
      %63 = vector.multi_reduction <add>, %62, %cst_16 [1] : vector<8x8xf32> to vector<8xf32>
      %64 = vector.shape_cast %63 : vector<8xf32> to vector<8x1xf32>
      %65 = arith.addf %59, %64 : vector<8x1xf32>
      %c1_i32_17 = arith.constant 1 : i32
      %c8_i32_18 = arith.constant 8 : i32
      %66 = arith.muli %c1_i32_17, %c8_i32_18 : i32
      %67 = tpu.assume_multiple %66, 8 : i32
      %68 = arith.index_cast %67 : i32 to index
      %c0_19 = arith.constant 0 : index
      %69 = vector.load %arg2[%68, %c0_19] : memref<16x256xf32, #tpu.memory_space<vmem>>, vector<8x256xf32>
      %cst_20 = arith.constant 0.000000e+00 : f32
      %70 = vector.broadcast %cst_20 : f32 to vector<8x8x128xf32>
      %71 = vector.extract_strided_slice %17 {offsets = [0, 0], sizes = [8, 128], strides = [1, 1]} : vector<8x256xf32> to vector<8x128xf32>
      %72 = vector.extract_strided_slice %69 {offsets = [0, 0], sizes = [8, 128], strides = [1, 1]} : vector<8x256xf32> to vector<8x128xf32>
      %73 = vector.shape_cast %71 : vector<8x128xf32> to vector<8x1x128xf32>
      %74 = vector.shape_cast %72 : vector<8x128xf32> to vector<1x8x128xf32>
      %75 = vector.broadcast %73 : vector<8x1x128xf32> to vector<8x8x128xf32>
      %76 = vector.broadcast %74 : vector<1x8x128xf32> to vector<8x8x128xf32>
      %77 = arith.addf %75, %76 : vector<8x8x128xf32>
      %cst_21 = arith.constant 0.000000e+00 : f32
      %78 = vector.broadcast %cst_21 : f32 to vector<8x8x128xf32>
      %79 = arith.maximumf %77, %78 : vector<8x8x128xf32>
      %80 = vector.shape_cast %6 : vector<8x128xf32> to vector<1x8x128xf32>
      %81 = vector.broadcast %80 : vector<1x8x128xf32> to vector<8x8x128xf32>
      %82 = arith.mulf %79, %81 : vector<8x8x128xf32>
      %83 = arith.addf %70, %82 : vector<8x8x128xf32>
      %84 = vector.extract_strided_slice %17 {offsets = [0, 128], sizes = [8, 128], strides = [1, 1]} : vector<8x256xf32> to vector<8x128xf32>
      %85 = vector.extract_strided_slice %69 {offsets = [0, 128], sizes = [8, 128], strides = [1, 1]} : vector<8x256xf32> to vector<8x128xf32>
      %86 = vector.shape_cast %84 : vector<8x128xf32> to vector<8x1x128xf32>
      %87 = vector.shape_cast %85 : vector<8x128xf32> to vector<1x8x128xf32>
      %88 = vector.broadcast %86 : vector<8x1x128xf32> to vector<8x8x128xf32>
      %89 = vector.broadcast %87 : vector<1x8x128xf32> to vector<8x8x128xf32>
      %90 = arith.addf %88, %89 : vector<8x8x128xf32>
      %cst_22 = arith.constant 0.000000e+00 : f32
      %91 = vector.broadcast %cst_22 : f32 to vector<8x8x128xf32>
      %92 = arith.maximumf %90, %91 : vector<8x8x128xf32>
      %93 = vector.shape_cast %9 : vector<8x128xf32> to vector<1x8x128xf32>
      %94 = vector.broadcast %93 : vector<1x8x128xf32> to vector<8x8x128xf32>
      %95 = arith.mulf %92, %94 : vector<8x8x128xf32>
      %96 = arith.addf %83, %95 : vector<8x8x128xf32>
      %cst_23 = arith.constant dense<0.000000e+00> : vector<8x8xf32>
      %97 = vector.multi_reduction <add>, %96, %cst_23 [2] : vector<8x8x128xf32> to vector<8x8xf32>
      %cst_24 = arith.constant dense<0xFF800000> : vector<8xf32>
      %98 = vector.multi_reduction <maximumf>, %97, %cst_24 [1] : vector<8x8xf32> to vector<8xf32>
      %99 = vector.shape_cast %98 : vector<8xf32> to vector<8x1xf32>
      %100 = arith.maximumf %56, %99 : vector<8x1xf32>
      %101 = arith.subf %56, %100 : vector<8x1xf32>
      %102 = math.exp %101 : vector<8x1xf32>
      %103 = arith.mulf %102, %65 : vector<8x1xf32>
      %104 = vector.broadcast %100 : vector<8x1xf32> to vector<8x8xf32>
      %105 = arith.subf %97, %104 : vector<8x8xf32>
      %106 = math.exp %105 : vector<8x8xf32>
      %cst_25 = arith.constant dense<0.000000e+00> : vector<8xf32>
      %107 = vector.multi_reduction <add>, %106, %cst_25 [1] : vector<8x8xf32> to vector<8xf32>
      %108 = vector.shape_cast %107 : vector<8xf32> to vector<8x1xf32>
      %109 = arith.addf %103, %108 : vector<8x1xf32>
      %c2_i32_26 = arith.constant 2 : i32
      %110 = arith.index_cast %15 : i32 to index
      %c0_27 = arith.constant 0 : index
      %111 = vector.load %arg6[%110, %c0_27] : memref<16x1xf32, #tpu.memory_space<vmem>>, vector<8x1xf32>
      tpu.vector_store %arg6[%110, %c0_27], %100 {strides = array<i32>} : memref<16x1xf32, #tpu.memory_space<vmem>>, vector<8x1xf32>,
      %112 = arith.index_cast %15 : i32 to index
      %c0_28 = arith.constant 0 : index
      %113 = vector.load %arg7[%112, %c0_28] : memref<16x1xf32, #tpu.memory_space<vmem>>, vector<8x1xf32>
      tpu.vector_store %arg7[%112, %c0_28], %109 {strides = array<i32>} : memref<16x1xf32, #tpu.memory_space<vmem>>, vector<8x1xf32>,
    }
    %c2_i32_3 = arith.constant 2 : i32
    %c1_i32_4 = arith.constant 1 : i32
    %11 = arith.cmpi eq, %arg1, %c1_i32_4 : i32
    %12 = arith.extui %11 : i1 to i32
    %c0_i32_5 = arith.constant 0 : i32
    %13 = arith.cmpi ne, %12, %c0_i32_5 : i32
    scf.if %13 {
      %c0_6 = arith.constant 0 : index
      %c0_7 = arith.constant 0 : index
      %14 = vector.load %arg6[%c0_6, %c0_7] : memref<16x1xf32, #tpu.memory_space<vmem>>, vector<16x1xf32>
      %c0_8 = arith.constant 0 : index
      %c0_9 = arith.constant 0 : index
      %15 = vector.load %arg7[%c0_8, %c0_9] : memref<16x1xf32, #tpu.memory_space<vmem>>, vector<16x1xf32>
      %16 = math.log %15 : vector<16x1xf32>
      %17 = arith.addf %14, %16 : vector<16x1xf32>
      %c0_10 = arith.constant 0 : index
      %c0_11 = arith.constant 0 : index
      %18 = vector.load %arg5[%c0_10, %c0_11] : memref<16x1xf32, #tpu.memory_space<vmem>>, vector<16x1xf32>
      tpu.vector_store %arg5[%c0_10, %c0_11], %17 {strides = array<i32>} : memref<16x1xf32, #tpu.memory_space<vmem>>, vector<16x1xf32>,
    } else {
    }
    return
  }
  func.func @transform_0(%arg0: i32, %arg1: i32) -> (i32, i32) {
    %c0_i32 = arith.constant 0 : i32
    %c0_i32_0 = arith.constant 0 : i32
    return %arg1, %c0_i32 : i32, i32
  }
  func.func @transform_1(%arg0: i32, %arg1: i32) -> (i32, i32) {
    %c0_i32 = arith.constant 0 : i32
    %c0_i32_0 = arith.constant 0 : i32
    return %arg0, %c0_i32 : i32, i32
  }
  func.func @transform_2(%arg0: i32, %arg1: i32) -> (i32, i32) {
    %c0_i32 = arith.constant 0 : i32
    %c0_i32_0 = arith.constant 0 : i32
    %c0_i32_1 = arith.constant 0 : i32
    return %c0_i32, %c0_i32_0 : i32, i32
  }
  func.func @transform_3(%arg0: i32, %arg1: i32) -> (i32, i32) {
    %c0_i32 = arith.constant 0 : i32
    %c0_i32_0 = arith.constant 0 : i32
    return %arg0, %c0_i32 : i32, i32
  }
}

</mosaic_0001>

<bundles_post_ra>
// kernel: tpu_custom_call.1
= control target key start
LH: loop header
LB: loop body
LE: loop exit
PB: predicated region body
PF: predicated region fallthrough
CT: control target
= control target key end

     0   :  { %8 = vsyncpa [#allocation5], 0  ;;  %s2175_s0 = inlined_call_operand.hbm [shape: f32[32,256], index: 0, kind: input, shape index: {}]   ;;  %s2176_s1 = inlined_call_operand.hbm [shape: f32[32,256], index: 1, kind: input, shape index: {}]   ;;  %s2177_s2 = inlined_call_operand.vmem [shape: f32[1,256], index: 2, kind: input, shape index: {}]   ;;  %s2178_s3 = inlined_call_operand.vmem [shape: f32[32,1], index: 3, kind: output, shape index: {}]  }
   0x1   :  { %10 = vsyncpa [#allocation5 + $0x1], 0 }
   0x2   :  { %11 = vsyncpa [#allocation7], 0 }
   0x3   :  { %13 = vsyncpa [#allocation7 + $0x1], 0  ;;  %s1563_s12 = smov 0   ;;  %s1565_s13 = smov 0  }
   0x4   :  { %s1567_s14 = smov 0   ;;  %s1569_s15 = smov 0  }
   0x5   :  { %s1571_s16 = smov 0   ;;  %s1573_s17 = smov 0  }
   0x6   :  { %s1575_s18 = smov 0   ;;  %s1577_s19 = smov 0  }
   0x7   :  { %s1579_s20 = smov 0   ;;  %s1581_s21 = smov 0  }
   0x8   :  { %s1583_s22 = smov 0  }
   0x9 LB: > { %s1182_s23 = sadd.s32 4294967295, %s1529_s22   ;;  %s28_s24 = sadd.s32 1, %s1521_s20  ;;  %s1529_s22 = sphi %s1583_s22, %s19_s22   ;;  %s1525_s21 = sphi %s1581_s21, %s2210_s21   ;;  %s1521_s20 = sphi %s1579_s20, %s2209_s20   ;;  %s1517_s19 = sphi %s1577_s19, %s2208_s19   ;;  %s1513_s18 = sphi %s1575_s18, %s2207_s18   ;;  %s1509_s17 = sphi %s1573_s17, %s2206_s17   ;;  %s1505_s16 = sphi %s1571_s16, %s2205_s16   ;;  %s1501_s15 = sphi %s1569_s15, %s2204_s15   ;;  %s1497_s14 = sphi %s1567_s14, %s2203_s14   ;;  %s1493_s13 = sphi %s1565_s13, %s2202_s13   ;;  %s1489_s12 = sphi %s1563_s12, %s2201_s12  }
   0xa   : > { %p1618_p0 = scmp.ge.s32.totalorder %s28_s24, 2  ;;  %s38_s26 = sadd.s32 1, %s1509_s17 }
   0xb   : > { %p45_p1 = scmp.ne.s32.totalorder %s1509_s17, %s1505_s16  ;;  %p2180_p2 = scmp.eq.s32.totalorder %s1529_s22, 0 }
   0xc   : > { %s2212_s24 = smov (%p1618_p0, %s28_s24), 0  ;;  %p51_p4 = scmp.ne.s32.totalorder %s1505_s16, %s1501_s15 }
   0xd   : > { %p1632_p3 = por %p2180_p2, %p45_p1  ;;  %s35_s28 = ssub.s32 %s1521_s20, %s2212_s24 }
   0xe   : > { %p1639_p5 = scmp.eq.s32.totalorder %s1182_s23, 0  ;;  %p36_p6 = scmp.eq.s32.totalorder %s35_s28, 0 }
   0xf   : > { %p2179_p8 = scmp.lt.s32.totalorder %s1529_s22, 4  ;;  %s151_s5 = sand.u32 1, %s1509_s17  }
  0x10   : > { %s2188_s29 = scalar_select %p1639_p5, 1, 0 }
  0x11   : > { %p1645_p7 = por %p1639_p5, %p51_p4  ;;  %s1209_s6 = sshll.u32 %s1521_s20, 9 }
  0x12   : > { %s1651_s4 = scalar_select %p36_p6, %s1509_s17, %s38_s26  }
  0x13   : > { %s2189_s30 = scalar_select %p1645_p7, 1, 0 }
  0x14   : > { %s1186_s7 = sshll.u32 %s151_s5, 5  ;;  %s1658_s10 = scalar_lea.hbm %s2175_s0, %s1209_s6 }
  0x15   : > { %s155_s11 = scalar_lea.vmem [#allocation4], %s1186_s7  ;;  %p1664_p9 = pnand %p2179_p8, %p1632_p3 }
  0x16   : > { %s163_s15 = sshll.u32 %s155_s11, 4  ;;  %s1670_s26 = scalar_lea.sflag [#allocation5], %s151_s5  ;;  %s1668_s15 = int_to_ptr.vmem [resolvable:$true] %s163_s15 }
  0x17   : > { %s1371_s28 = scalar_lea.hbm %s1658_s10, 512  ;;  %p1373_p11 = pneg %p1664_p9 }
  0x18   : > { %p1372_p10 = scmp.ne.s32.totalorder %s1658_s10, %s1371_s28  ;;  %s1376_s7 = scalar_lea.hbm %s2175_s0, 1024 }
  0x19   : > { %p1377_p1 = scmp.lt.u32.totalorder %s1658_s10, %s2175_s0  ;;  %p1378_p3 = scmp.lt.u32.totalorder %s1376_s7, %s1371_s28 }
  0x1a   : > { %p1374_p12 = pnand %p1373_p11, %p1372_p10  ;;  %p1380_p6 = scmp.lt.u32.totalorder %s1371_s28, %s1658_s10 }
  0x1b   : > { %p1379_p4 = por %p1378_p3, %p1377_p1 }
  0x1c   : > { %p1375_p13 = pneg %p1374_p12 }
  0x1d   : > { %p1381_p8 = por %p1380_p6, %p1379_p4 }
  0x1f   : > { %p1382_p2 = pnand %p1381_p8, %p1375_p13 }
  0x21   : > { %1385 = shalt.err (!%p1382_p2)
}
  0x22   : > { %s1386_s5 = scalar_lea.vmem %s1668_s15, 512  ;;  %s1535_s11 = smov [#allocation4]  }
  0x23   : > { %p1387_p10 = scmp.ne.s32.totalorder %s1668_s15, %s1386_s5  ;;  %s1391_s27 = sshll.u32 %s1535_s11, 4  ;;  %s1392_s27 = int_to_ptr.vmem [resolvable:$false] %s1391_s27 }
  0x24   : > { %s1393_s6 = scalar_lea.vmem %s1392_s27, 1024  ;;  %p1394_p5 = scmp.lt.s32.totalorder %s1668_s15, %s1392_s27 }
  0x25   : > { %p1389_p12 = pnand %p1387_p10, %p1373_p11  ;;  %p1395_p1 = scmp.lt.s32.totalorder %s1393_s6, %s1386_s5 }
  0x27   : > { %p1390_p7 = pneg %p1389_p12  ;;  %p1396_p3 = por %p1395_p1, %p1394_p5 }
  0x29   : > { %p1397_p4 = pnand %p1396_p3, %p1390_p7 }
  0x2b   : > { %1400 = shalt.err (!%p1397_p4)
}
  0x2c   : > { %s2183_s28 = smov 256   ;;  %s2184_s7 = smov 16  }
  0x2d   : > { %1220 = dma.hbm_to_vmem [thread:$0]  (!%p1664_p9), %s1658_s10, 512, %s1668_s15, %s1670_s26, %s2183_s28, %s2183_s28, %s2184_s7  }
  0x2e   : > { %p1194_p2 = scmp.ge.s32.totalorder %s1529_s22, 1  ;;  %p193_p5 = scmp.lt.s32.totalorder %s1529_s22, 5 }
  0x2f   : > { %s31_s9 = sadd.s32 1, %s1525_s21  ;;  %p71_p8 = scmp.ne.s32.totalorder %s1497_s14, %s1493_s13 }
  0x30   : > { %p1703_p7 = pnand %p1194_p2, %p193_p5  ;;  %s2214_s9 = smov (!%p1618_p0, %s31_s9), %s1525_s21 }
  0x31   : > { %p33_p11 = scmp.ge.s32.totalorder %s2214_s9, 2  ;;  %p77_p13 = scmp.ne.s32.totalorder %s1493_s13, %s1489_s12 }
  0x32   : > { %s64_s23 = sadd.s32 1, %s1497_s14  ;;  %s173_s5 = sand.u32 1, %s1497_s14  }
  0x33   : > { %s2216_s9 = smov (%p33_p11, %s2214_s9), 0  ;;  %p2192_p9 = scmp.eq.s32.totalorder %s1529_s22, 0 }
  0x34   : > { %p2193_p10 = scmp.ne.s32.totalorder %s2188_s29, 0  ;;  %s61_s15 = ssub.s32 %s1525_s21, %s2216_s9 }
  0x35   : > { %p73_p6 = por %p71_p8, %p2192_p9  ;;  %s1190_s25 = sshll.u32 %s173_s5, 5 }
  0x36   : > { %p1723_p12 = por %p77_p13, %p2193_p10  ;;  %p62_p1 = scmp.eq.s32.totalorder %s61_s15, 0 }
  0x37   : > { %s1211_s26 = sshll.u32 %s1525_s21, 9  ;;  %s177_s11 = scalar_lea.vmem [#allocation6], %s1190_s25 }
  0x38   : > { %s2194_s10 = scalar_select %p1723_p12, 1, 0 }
  0x39   : > { %s185_s27 = sshll.u32 %s177_s11, 4  ;;  %s1736_s7 = scalar_lea.hbm %s2176_s1, %s1211_s26  ;;  %s1738_s27 = int_to_ptr.vmem [resolvable:$true] %s185_s27 }
  0x3a   : > { %s1731_s6 = scalar_select %p62_p1, %s1497_s14, %s64_s23  }
  0x3b   : > { %p2195_p0 = scmp.lt.s32.totalorder %s1529_s22, 4  ;;  %s1746_s23 = scalar_lea.sflag [#allocation7], %s173_s5 }
  0x3c   : > { %s1401_s15 = scalar_lea.hbm %s1736_s7, 512  ;;  %s1406_s26 = scalar_lea.hbm %s2176_s1, 1024 }
  0x3d   : > { %p1742_p3 = pnand %p2195_p0, %p73_p6  ;;  %p1402_p4 = scmp.ne.s32.totalorder %s1736_s7, %s1401_s15 }
  0x3e   : > { %p1407_p11 = scmp.lt.u32.totalorder %s1736_s7, %s2176_s1  ;;  %p1408_p13 = scmp.lt.u32.totalorder %s1406_s26, %s1401_s15 }
  0x3f   : > { %p1403_p2 = pneg %p1742_p3  ;;  %p1410_p6 = scmp.lt.u32.totalorder %s1401_s15, %s1736_s7 }
  0x40   : > { %p1409_p9 = por %p1408_p13, %p1407_p11 }
  0x41   : > { %p1404_p5 = pnand %p1403_p2, %p1402_p4 }
  0x42   : > { %p1411_p10 = por %p1410_p6, %p1409_p9 }
  0x43   : > { %p1405_p8 = pneg %p1404_p5 }
  0x45   : > { %p1412_p1 = pnand %p1411_p10, %p1405_p8 }
  0x47   : > { %1415 = shalt.err (!%p1412_p1)
}
  0x48   : > { %s1416_s5 = scalar_lea.vmem %s1738_s27, 512  ;;  %s1538_s28 = smov [#allocation6]  }
  0x49   : > { %p1417_p0 = scmp.ne.s32.totalorder %s1738_s27, %s1416_s5  ;;  %s1421_s25 = sshll.u32 %s1538_s28, 4  ;;  %s1422_s25 = int_to_ptr.vmem [resolvable:$false] %s1421_s25 }
  0x4a   : > { %s1423_s11 = scalar_lea.vmem %s1422_s25, 1024  ;;  %p1424_p12 = scmp.lt.s32.totalorder %s1738_s27, %s1422_s25 }
  0x4b   : > { %p1419_p4 = pnand %p1417_p0, %p1403_p2  ;;  %p1425_p11 = scmp.lt.s32.totalorder %s1423_s11, %s1416_s5 }
  0x4d   : > { %p1420_p5 = pneg %p1419_p4  ;;  %p1426_p13 = por %p1425_p11, %p1424_p12 }
  0x4f   : > { %p1427_p9 = pnand %p1426_p13, %p1420_p5 }
  0x51   : > { %1430 = shalt.err (!%p1427_p9)
}
  0x52   : > { %s2197_s15 = smov 16   ;;  %s2198_s26 = smov 256  }
  0x53   : > { %1223 = dma.hbm_to_vmem [thread:$0]  (!%p1742_p3), %s1736_s7, 512, %s1738_s27, %s1746_s23, %s2198_s26, %s2198_s26, %s2197_s15  }
  0x54   : > { %197 = sbr.rel (%p1703_p7) target bundleno = 931 (0x3a3), region = 32  ;;  %s199_s12 = sand.u32 (!%p1703_p7), 1, %s1505_s16  }
  0x55   : > { %s1195_s28 = sshll.u32 (!%p1703_p7), %s199_s12, 5  ;;  %s200_s5 = scalar_lea.sflag (!%p1703_p7), [#allocation5], %s199_s12 }
  0x56   : > { %s1780_s25 = scalar_lea.vmem (!%p1703_p7), [#allocation4], %s1195_s28  ;;  %p2199_p12 = scmp.ne.s32.totalorder (!%p1703_p7), %s2189_s30, 0 }
  0x5b   : > { %1480 = dma.done.wait (%p2199_p12), %s200_s5, 512  }
  0x5c   : > { %1482 = vsyncadd (%p2199_p12), %s200_s5, 4294966784  ;;  %s208_s29 = sand.u32 1, %s1493_s13   ;;  %p2200_p7 = scmp.ne.s32.totalorder %s2194_s10, 0 }
  0x5d   : > { %s1787_s11 = sshll.u32 %s208_s29, 5  ;;  %s209_s7 = scalar_lea.sflag [#allocation7], %s208_s29 }
  0x5e   : > { %s212_s8 = scalar_lea.vmem [#allocation6], %s1787_s11 }
  0x5f   : > { %1484 = dma.done.wait (%p2200_p7), %s209_s7, 512  }
  0x60   : > { %1486 = vsyncadd (%p2200_p7), %s209_s7, 4294966784  ;;  %s1197_s27 = sshll.u32 %s1517_s19, 1  ;;  %p1199_p2 = scmp.ne.s32.totalorder %s1513_s18, 0 }
  0x61   : > { %p243_p3 = scmp.lt.s32.totalorder %s1197_s27, 3  ;;  %vm252_vm0 = vcmask (!%p1199_p2), 7168   ;;  %v1539_v0 = vmov (!%p1199_p2), -inf   ;;  %v1540_v1 = vmov (!%p1199_p2), 0.0  }
  0x62   : > { %251 = sbr.rel (%p1199_p2) target bundleno = 105 (0x69), region = 44  ;;  %253 = vst.msk [vmem:[#allocation2] sm:$0xff] (!%p1199_p2), %vm252_vm0, %v1539_v0  ;;  %254 = vst.msk [vmem:[#allocation2 + $0x8] sm:$0xff] (!%p1199_p2), %vm252_vm0, %v1539_v0 }
  0x63   : > { %s2218_s27 = smov (!%p243_p3, %s1197_s27), 3  ;;  %255 = vst.msk [vmem:[#allocation3] sm:$0xff] (!%p1199_p2), %vm252_vm0, %v1540_v1  ;;  %256 = vst.msk [vmem:[#allocation3 + $0x8] sm:$0xff] (!%p1199_p2), %vm252_vm0, %v1540_v1 }
  0x64   : > { %s1198_s23 = sshll.u32 %s2218_s27, 3 }
  0x65   : > { %s1798_s26 = scalar_lea.vmem %s2178_s3, %s1198_s23 }
  0x69 PF: > { %v1804_v2 = vld [vmem:[%s2177_s2] sm:$0x3]  ;;  %s1806_s12 = smov 0  }
  0x6a LB: >> { %v286_v3 = vlaneseq  ;;  %v1541_v4 = vmov 1966171168   ;;  %s1812_s28 = sshll.u32 %s1533_s12, 3  ;;  %v515_v12 = vrot.slane %v1804_v2, 1  ;;  %v1832_v21 = vld [vmem:[%s1780_s25] sm:$0xff]  ;;  %v1835_v22 = vld [vmem:[%s1780_s25 + $0x8] sm:$0xff]  ;;  %s1533_s12 = sphi %s1806_s12, %s263_s12  }
  0x6b   : >> { %v284_v5 = vunpack.c.l.s4 %v1541_v4  ;;  %s265_s5 = sshra.s32 %s1812_s28, 3  ;;  %v1853_v31 = vld [vmem:[%s1780_s25 + $0x10] sm:$0xff]  ;;  %v1856_v32 = vld [vmem:[%s1780_s25 + $0x18] sm:$0xff]  ;;  %vm595_vm1 = vcmask 1041409   ;;  %vm597_vm2 = vcmask 1042434   ;;  %vm599_vm3 = vcmask 1043459  }
  0x6c   : >> { %v1815_v6 = vshrl.u32 %v286_v3, 7  ;;  %s1212_s29 = sshll.u32 %s265_s5, 4  ;;  %vm601_vm4 = vcmask 1044484   ;;  %vm603_vm5 = vcmask 1045509   ;;  %vm605_vm6 = vcmask 1046534   ;;  %s272_s27 = scalar_lea.vmem [#allocation2], %s1812_s28 }
  0x6d   : >> { %v285_v7 = vunpack.c.0.s8 %v284_v5  ;;  %s269_s7 = scalar_lea.vmem %s212_s8, %s1212_s29 [#allocation6]  ;;  %vm607_vm7 = vcmask 1047559   ;;  %vm610_vm8 = vcmask 64512   ;;  %vm1048_vm9 = vcmask 7168   ;;  %s274_s23 = scalar_lea.vmem [#allocation3], %s1812_s28 }
  0x6e   : >> { %v270_v9 = vld [vmem:[%s269_s7] sm:$0xff]  ;;  %v271_v10 = vld [vmem:[%s269_s7 + $0x8] sm:$0xff]  ;;  %v1824_v11 = vsub.s32 0, %v1815_v6  ;;  %s263_s12 = sadd.s32 1, %s1533_s12  }
  0x6f   : >> { %v1821_v8 = vsub.s32 %v285_v7, %v1815_v6  ;;  %v410_v14 = vcombine.high %v271_v10, %v271_v10  ;;  %v282_v16 = vcombine.high %v270_v9, %v270_v9  ;;  %p260_p8 = scmp.ge.s32.totalorder %s263_s12, 2  }
  0x70   : >> { %v1839_v23 = vrot.slane %v1804_v2, %v1824_v11  ;;  %v1842_v24 = vrot.slane %v515_v12, %v1824_v11  ;;  %p1205_p6 = scmp.ne.s32.totalorder (%p260_p8), %s1513_s18, 1 }
  0x71   : >> { %v289_v13 = vrot.slane %v270_v9, %v1821_v8  ;;  %v417_v15 = vrot.slane %v271_v10, %v1821_v8  ;;  %v1845_v25 = vrot.slane %v282_v16, %v1821_v8  ;;  %v1848_v26 = vrot.slane %v410_v14, %v1821_v8 }
  0x73   : >> { %v305_v17 = vrot.slane %v289_v13, %v1821_v8  ;;  %v433_v18 = vrot.slane %v417_v15, %v1821_v8  ;;  %v297_v19 = vcombine.high %v289_v13, %v289_v13  ;;  %v425_v20 = vcombine.high %v417_v15, %v417_v15 }
  0x74   : >> { %v1862_v35 = vrot.slane %v1845_v25, %v1821_v8  ;;  %v1866_v36 = vrot.slane %v1848_v26, %v1821_v8 }
  0x75   : >> { %v334_v27 = vrot.slane %v305_v17, %v1824_v11  ;;  %v462_v28 = vrot.slane %v433_v18, %v1824_v11  ;;  %v327_v29 = vcombine.high %v305_v17, %v305_v17  ;;  %v455_v30 = vcombine.high %v433_v18, %v433_v18 }
  0x76   : >> { %v319_v33 = vrot.slane %v297_v19, %v1821_v8  ;;  %v447_v34 = vrot.slane %v425_v20, %v1821_v8  ;;  %v350_v16 = vrot.slane %v1862_v35, %v1824_v11  ;;  %v478_v17 = vrot.slane %v1866_v36, %v1824_v11 }
  0x77   : >> { %v371_v37 = vadd.f32 %v334_v27, %v1832_v21  ;;  %v499_v38 = vadd.f32 %v462_v28, %v1835_v22  ;;  %v342_v39 = vrot.slane %v327_v29, %v1824_v11  ;;  %v470_v40 = vrot.slane %v455_v30, %v1824_v11 }
  0x78   : >> { %v768_v41 = vadd.f32 %v1853_v31, %v334_v27  ;;  %v800_v42 = vadd.f32 %v1856_v32, %v462_v28  ;;  %v338_v43 = vrot.slane %v319_v33, %v1824_v11  ;;  %v466_v44 = vrot.slane %v447_v34, %v1824_v11 }
  0x79   : >> { %v379_v45 = vmax.f32 %v371_v37, 0.0  ;;  %v507_v46 = vmax.f32 %v499_v38, 0.0  ;;  %v373_v47 = vadd.f32 %v342_v39, %v1832_v21  ;;  %v501_v48 = vadd.f32 %v470_v40, %v1835_v22 }
  0x7a   : >> { %v776_v49 = vmax.f32 %v768_v41, 0.0  ;;  %v808_v50 = vmax.f32 %v800_v42, 0.0  ;;  %v769_v51 = vadd.f32 %v1853_v31, %v338_v43  ;;  %v801_v52 = vadd.f32 %v1856_v32, %v466_v44 }
  0x7b   : >> { %v393_v53 = vmul.f32 %v1839_v23, %v379_v45  ;;  %v521_v54 = vmul.f32 %v1842_v24, %v507_v46  ;;  %v381_v55 = vmax.f32 %v373_v47, 0.0  ;;  %v509_v56 = vmax.f32 %v501_v48, 0.0 }
  0x7c   : >> { %v784_v57 = vmul.f32 %v776_v49, %v1839_v23  ;;  %v816_v58 = vmul.f32 %v808_v50, %v1842_v24  ;;  %v777_v59 = vmax.f32 %v769_v51, 0.0  ;;  %v809_v60 = vmax.f32 %v801_v52, 0.0 }
  0x7d   : >> { %v529_v61 = vadd.f32 %v521_v54, %v393_v53  ;;  %v395_v62 = vmul.f32 %v1839_v23, %v381_v55  ;;  %v523_v63 = vmul.f32 %v1842_v24, %v509_v56  ;;  %v372_v0 = vadd.f32 %v338_v43, %v1832_v21 }
  0x7e   : >> { %v824_v1 = vadd.f32 %v816_v58, %v784_v57  ;;  %v785_v4 = vmul.f32 %v777_v59, %v1839_v23  ;;  %v817_v5 = vmul.f32 %v809_v60, %v1842_v24  ;;  %v500_v7 = vadd.f32 %v466_v44, %v1835_v22 }
  0x7f   : >> { %537 = vadd.xlane.f32.xlu0 %v529_v61  ;;  %v531_v9 = vadd.f32 %v523_v63, %v395_v62  ;;  %v380_v10 = vmax.f32 %v372_v0, 0.0  ;;  %v770_v12 = vadd.f32 %v1853_v31, %v342_v39  ;;  %v802_v13 = vadd.f32 %v1856_v32, %v470_v40 }
  0x80   : >> { %v825_v14 = vadd.f32 %v817_v5, %v785_v4  ;;  %v508_v15 = vmax.f32 %v500_v7, 0.0  ;;  %v329_v27 = vcombine.high %v319_v33, %v319_v33  ;;  %v375_v29 = vadd.f32 %v350_v16, %v1832_v21 }
  0x81   : >> { %541 = vadd.xlane.f32.xlu1 %v531_v9  ;;  %v394_v18 = vmul.f32 %v1839_v23, %v380_v10  ;;  %v778_v19 = vmax.f32 %v770_v12, 0.0  ;;  %v810_v20 = vmax.f32 %v802_v13, 0.0  ;;  %v503_v30 = vadd.f32 %v478_v17, %v1835_v22 }
  0x82   : >> { %v522_v28 = vmul.f32 %v1842_v24, %v508_v15  ;;  %v457_v37 = vcombine.high %v447_v34, %v447_v34  ;;  %v346_v40 = vrot.slane %v329_v27, %v1824_v11  ;;  %v772_v41 = vadd.f32 %v1853_v31, %v350_v16 }
  0x83   : >> { %832 = vadd.xlane.f32.xlu0 %v824_v1  ;;  %v786_v38 = vmul.f32 %v778_v19, %v1839_v23  ;;  %v818_v39 = vmul.f32 %v810_v20, %v1842_v24  ;;  %v383_v43 = vmax.f32 %v375_v29, 0.0  ;;  %v511_v44 = vmax.f32 %v503_v30, 0.0 }
  0x84   : >> { %v530_v42 = vadd.f32 %v522_v28, %v394_v18  ;;  %v474_v33 = vrot.slane %v457_v37, %v1824_v11  ;;  %v374_v46 = vadd.f32 %v346_v40, %v1832_v21  ;;  %v780_v47 = vmax.f32 %v772_v41, 0.0 }
  0x85   : >> { %834 = vadd.xlane.f32.xlu1 %v825_v14  ;;  %v826_v45 = vadd.f32 %v818_v39, %v786_v38  ;;  %v804_v34 = vadd.f32 %v1856_v32, %v478_v17  ;;  %v397_v48 = vmul.f32 %v1839_v23, %v383_v43  ;;  %v525_v49 = vmul.f32 %v1842_v24, %v511_v44 }
  0x86   : >> { %v502_v50 = vadd.f32 %v474_v33, %v1835_v22  ;;  %v298_v51 = vcombine.high %v1845_v25, %v1845_v25  ;;  %v382_v52 = vmax.f32 %v374_v46, 0.0  ;;  %v788_v53 = vmul.f32 %v780_v47, %v1839_v23 }
  0x87   : >> { %539 = vadd.xlane.f32.xlu0 %v530_v42  ;;  %v812_v54 = vmax.f32 %v804_v34, 0.0  ;;  %v426_v55 = vcombine.high %v1848_v26, %v1848_v26  ;;  %v533_v56 = vadd.f32 %v525_v49, %v397_v48  ;;  %v328_v59 = vcombine.high %v1862_v35, %v1862_v35 }
  0x88   : >> { %v510_v57 = vmax.f32 %v502_v50, 0.0  ;;  %v326_v58 = vrot.slane %v298_v51, %v1821_v8  ;;  %v396_v60 = vmul.f32 %v1839_v23, %v382_v52  ;;  %v456_v62 = vcombine.high %v1866_v36, %v1866_v36 }
  0x89   : >> { %836 = vadd.xlane.f32.xlu1 %v826_v45  ;;  %v820_v25 = vmul.f32 %v812_v54, %v1842_v24  ;;  %v454_v61 = vrot.slane %v426_v55, %v1821_v8  ;;  %v358_v0 = vrot.slane %v328_v59, %v1824_v11  ;;  %v771_v1 = vadd.f32 %v1853_v31, %v346_v40 }
  0x8a   : >> { %v524_v63 = vmul.f32 %v1842_v24, %v510_v57  ;;  %v354_v26 = vrot.slane %v326_v58, %v1824_v11  ;;  %v486_v5 = vrot.slane %v456_v62, %v1824_v11  ;;  %v803_v7 = vadd.f32 %v1856_v32, %v474_v33 }
  0x8b   : >> { %545 = vadd.xlane.f32.xlu0 %v533_v56  ;;  %v828_v35 = vadd.f32 %v820_v25, %v788_v53  ;;  %v482_v4 = vrot.slane %v454_v61, %v1824_v11  ;;  %v377_v36 = vadd.f32 %v358_v0, %v1832_v21  ;;  %v779_v10 = vmax.f32 %v771_v1, 0.0 }
  0x8c   : >> { %v532_v8 = vadd.f32 %v524_v63, %v396_v60  ;;  %v376_v9 = vadd.f32 %v354_v26, %v1832_v21  ;;  %v505_v13 = vadd.f32 %v486_v5, %v1835_v22  ;;  %v811_v14 = vmax.f32 %v803_v7, 0.0 }
  0x8d   : >> { %v504_v12 = vadd.f32 %v482_v4, %v1835_v22  ;;  %v330_v15 = vcombine.high %v326_v58, %v326_v58  ;;  %v385_v17 = vmax.f32 %v377_v36, 0.0  ;;  %v787_v18 = vmul.f32 %v779_v10, %v1839_v23 }
  0x8e   : >> { %543 = vadd.xlane.f32.xlu1 %v532_v8  ;;  %v384_v16 = vmax.f32 %v376_v9, 0.0  ;;  %v458_v19 = vcombine.high %v454_v61, %v454_v61  ;;  %v513_v27 = vmax.f32 %v505_v13, 0.0  ;;  %v819_v28 = vmul.f32 %v811_v14, %v1842_v24 }
  0x8f   : >> { %840 = vadd.xlane.f32.xlu0 %v828_v35  ;;  %v512_v20 = vmax.f32 %v504_v12, 0.0  ;;  %v362_v29 = vrot.slane %v330_v15, %v1824_v11  ;;  %v399_v37 = vmul.f32 %v1839_v23, %v385_v17  ;;  %v773_v39 = vadd.f32 %v1853_v31, %v354_v26 }
  0x90   : >> { %v398_v30 = vmul.f32 %v1839_v23, %v384_v16  ;;  %v490_v38 = vrot.slane %v458_v19, %v1824_v11  ;;  %v527_v41 = vmul.f32 %v1842_v24, %v513_v27  ;;  %v827_v42 = vadd.f32 %v819_v28, %v787_v18 }
  0x91   : >> { %v526_v40 = vmul.f32 %v1842_v24, %v512_v20  ;;  %v378_v43 = vadd.f32 %v362_v29, %v1832_v21  ;;  %v781_v33 = vmax.f32 %v773_v39, 0.0  ;;  %v805_v45 = vadd.f32 %v1856_v32, %v482_v4 }
  0x92   : >> { %v506_v44 = vadd.f32 %v490_v38, %v1835_v22  ;;  %v774_v46 = vadd.f32 %v1853_v31, %v358_v0  ;;  %v535_v34 = vadd.f32 %v527_v41, %v399_v37  ;;  %v806_v49 = vadd.f32 %v1856_v32, %v486_v5 }
  0x93   : >> { %v534_v47 = vadd.f32 %v526_v40, %v398_v30  ;;  %v386_v48 = vmax.f32 %v378_v43, 0.0  ;;  %v789_v51 = vmul.f32 %v781_v33, %v1839_v23  ;;  %v813_v52 = vmax.f32 %v805_v45, 0.0 }
  0x94   : >> { %v514_v50 = vmax.f32 %v506_v44, 0.0  ;;  %v782_v53 = vmax.f32 %v774_v46, 0.0  ;;  %549 = vadd.xlane.f32.xlu0 %v535_v34  ;;  %v814_v22 = vmax.f32 %v806_v49, 0.0  ;;  %v775_v54 = vadd.f32 %v1853_v31, %v362_v29 }
  0x95   : >> { %547 = vadd.xlane.f32.xlu1 %v534_v47  ;;  %v400_v21 = vmul.f32 %v1839_v23, %v386_v48  ;;  %v807_v55 = vadd.f32 %v1856_v32, %v490_v38  ;;  %v821_v57 = vmul.f32 %v813_v52, %v1842_v24  ;;  %v562_v5 = vand.u32 127, %v286_v3 }
  0x96   : >> { %v528_v56 = vmul.f32 %v1842_v24, %v514_v50  ;;  %v790_v58 = vmul.f32 %v782_v53, %v1839_v23  ;;  %v822_v59 = vmul.f32 %v814_v22, %v1842_v24  ;;  %v783_v60 = vmax.f32 %v775_v54, 0.0 }
  0x97   : >> { %v815_v25 = vmax.f32 %v807_v55, 0.0  ;;  %v829_v62 = vadd.f32 %v821_v57, %v789_v51  ;;  %v1542_v57 = vmov 0  }
  0x98   : >> { %v536_v61 = vadd.f32 %v528_v56, %v400_v21  ;;  %v791_v63 = vmul.f32 %v783_v60, %v1839_v23  ;;  %v830_v31 = vadd.f32 %v822_v59, %v790_v58  ;;  %1327 = vset.pattern.permute.xlu0 %v1542_v57  ;;  %1328 = vset.pattern.permute.xlu1 %v1542_v57  ;;  %v2043_v58 = vld [vmem:[%s272_s27] sm:$0xff] }
  0x99   : >> { %838 = vadd.xlane.f32.xlu1 %v827_v42  ;;  %v823_v26 = vmul.f32 %v815_v25, %v1842_v24  ;;  %v1972_v24 = vsub.s32 %v562_v5, %v1815_v6 }
  0x9a   : >> { %551 = vadd.xlane.f32.xlu0 %v536_v61 }
  0x9b   : >> { %v831_v32 = vadd.f32 %v823_v26, %v791_v63  ;;  %v629_v26 = vsub.s32 1, %v1815_v6 }
  0x9d   : >> { %842 = vadd.xlane.f32.xlu1 %v829_v62 }
  0x9e   : >> { %844 = vadd.xlane.f32.xlu0 %v830_v31  ;;  %v633_v31 = vsub.s32 2, %v1815_v6 }
  0xa1   : >> { %846 = vadd.xlane.f32.xlu1 %v831_v32 }
 0x10c   : >> { %v1958_v0 = vpop.xlane.xlu0 %537 }
 0x10d   : >> { %v566_v10 = vrot.slane %v1958_v0, %v1972_v24 }
 0x10e   : >> { %v1960_v1 = vpop.xlane.xlu1 %541 }
 0x10f   : >> { %v574_v14 = vrot.slane %v1960_v1, %v1972_v24 }
 0x110   : >> { %v1962_v35 = vpop.xlane.xlu0 %832 }
 0x111   : >> { %v859_v29 = vrot.slane %v1962_v35, %v1972_v24 }
 0x112   : >> { %v1964_v4 = vpop.xlane.xlu1 %834 }
 0x113   : >> { %v863_v19 = vrot.slane %v1964_v4, %v1972_v24 }
 0x114   : >> { %v1967_v7 = vpop.xlane.xlu0 %539 }
 0x115   : >> { %v570_v9 = vrot.slane %v1967_v7, %v1972_v24  ;;  %v888_v40 = vsel %vm595_vm1, %v863_v19, %v859_v29 }
 0x116   : >> { %v1969_v23 = vpop.xlane.xlu1 %836 }
 0x117   : >> { %v596_v3 = vsel %vm595_vm1, %v570_v9, %v566_v10  ;;  %v867_v28 = vrot.slane %v1969_v23, %v1972_v24  ;;  %v637_v10 = vsub.s32 3, %v1815_v6 }
 0x118   : >> { %v1974_v8 = vpop.xlane.xlu0 %545  ;;  %v598_v15 = vsel %vm597_vm2, %v574_v14, %v596_v3 }
 0x119   : >> { %v582_v20 = vrot.slane %v1974_v8, %v1972_v24  ;;  %v889_v43 = vsel %vm597_vm2, %v867_v28, %v888_v40 }
 0x11b   : >> { %v1978_v36 = vpop.xlane.xlu1 %543 }
 0x11c   : >> { %v1982_v12 = vpop.xlane.xlu0 %840  ;;  %v578_v13 = vrot.slane %v1978_v36, %v1972_v24 }
 0x11d   : >> { %v875_v46 = vrot.slane %v1982_v12, %v1972_v24 }
 0x11e   : >> { %v600_v16 = vsel %vm599_vm3, %v578_v13, %v598_v15 }
 0x11f   : >> { %v602_v37 = vsel %vm601_vm4, %v582_v20, %v600_v16  ;;  %v641_v16 = vsub.s32 4, %v1815_v6 }
 0x121   : >> { %v1993_v18 = vpop.xlane.xlu0 %549 }
 0x122   : >> { %v1991_v17 = vpop.xlane.xlu1 %547  ;;  %v590_v30 = vrot.slane %v1993_v18, %v1972_v24 }
 0x123   : >> { %v586_v27 = vrot.slane %v1991_v17, %v1972_v24 }
 0x125   : >> { %v604_v39 = vsel %vm603_vm5, %v586_v27, %v602_v37  ;;  %v645_v37 = vsub.s32 5, %v1815_v6 }
 0x126   : >> { %v2008_v38 = vpop.xlane.xlu1 %838  ;;  %v606_v45 = vsel %vm605_vm6, %v590_v30, %v604_v39 }
 0x127   : >> { %v871_v41 = vrot.slane %v2008_v38, %v1972_v24  ;;  %v2014_v42 = vpop.xlane.xlu0 %551 }
 0x128   : >> { %v594_v44 = vrot.slane %v2014_v42, %v1972_v24 }
 0x129   : >> { %v890_v33 = vsel %vm599_vm3, %v871_v41, %v889_v43 }
 0x12a   : >> { %v2023_v47 = vpop.xlane.xlu1 %842  ;;  %v608_v34 = vsel %vm607_vm7, %v594_v44, %v606_v45  ;;  %v891_v52 = vsel %vm601_vm4, %v875_v46, %v890_v33  ;;  %v649_v44 = vsub.s32 6, %v1815_v6 }
 0x12b   : >> { %v879_v48 = vrot.slane %v2023_v47, %v1972_v24  ;;  %v2028_v49 = vpop.xlane.xlu0 %844  ;;  %v611_v50 = vsel %vm610_vm8, %v608_v34, -inf }
 0x12c   : >> { %v883_v51 = vrot.slane %v2028_v49, %v1972_v24  ;;  %612 = vmax.xlane.f32.xlu0 %v611_v50 }
 0x12d   : >> { %v892_v53 = vsel %vm603_vm5, %v879_v48, %v891_v52 }
 0x12e   : >> { %v2035_v21 = vpop.xlane.xlu1 %846  ;;  %v893_v22 = vsel %vm605_vm6, %v883_v51, %v892_v53 }
 0x12f   : >> { %v887_v54 = vrot.slane %v2035_v21, %v1972_v24 }
 0x131   : >> { %v894_v55 = vsel %vm607_vm7, %v887_v54, %v893_v22 }
 0x132   : >> { %v896_v56 = vsel %vm610_vm8, %v894_v55, -inf }
 0x133   : >> { %897 = vmax.xlane.f32.xlu1 %v896_v56 }
 0x1b9   : >> { %v613_v59 = vpop.xlane.xlu0 %612 }
 0x1ba   : >> { %v2046_v60 = vmax.f32 %v2043_v58, %v613_v59 }
 0x1bc   : >> { %v615_v25 = vsub.f32 %v2043_v58, %v2046_v60  ;;  %621 = vperm.xlu0 %1327, %v2046_v60  }
 0x1c0   : >> { %v898_v61 = vpop.xlane.xlu1 %897 }
 0x1c1   : >> { %v2052_v62 = vmax.f32 %v2046_v60, %v898_v61 }
 0x1c3   : >> { %v900_v63 = vsub.f32 %v2046_v60, %v2052_v62  ;;  %1049 = vst.msk [vmem:[%s272_s27] sm:$0xff] %vm1048_vm9, %v2052_v62  ;;  %906 = vperm.xlu1 %1328, %v2052_v62  }
 0x23b   : >> { %v622_v32 = vpop.permute.xlu0 %621 }
 0x23c   : >> { %v626_v5 = vrot.slane %v622_v32, %v1824_v11  ;;  %v630_v9 = vrot.slane %v622_v32, %v629_v26  ;;  %v634_v3 = vrot.slane %v622_v32, %v633_v31  ;;  %v638_v19 = vrot.slane %v622_v32, %v637_v10 }
 0x23d   : >> { %v642_v39 = vrot.slane %v622_v32, %v641_v16  ;;  %v646_v33 = vrot.slane %v622_v32, %v645_v37  ;;  %v650_v51 = vrot.slane %v622_v32, %v649_v44 }
 0x23e   : >> { %v663_v13 = vsub.f32 %v1958_v0, %v626_v5  ;;  %v664_v14 = vsub.f32 %v1967_v7, %v630_v9  ;;  %v665_v20 = vsub.f32 %v1960_v1, %v634_v3  ;;  %v666_v0 = vsub.f32 %v1978_v36, %v638_v19 }
 0x23f   : >> { %v667_v45 = vsub.f32 %v1974_v8, %v642_v39  ;;  %v669_v55 = vsub.f32 %v1993_v18, %v650_v51 }
 0x240   : >> { %v671_v15 = vmul.f32 1.442695, %v663_v13  ;;  %v673_v27 = vmul.f32 1.442695, %v664_v14  ;;  %v675_v7 = vmul.f32 1.442695, %v665_v20 }
 0x241   : >> { %v677_v46 = vmul.f32 1.442695, %v666_v0  ;;  %v679_v52 = vmul.f32 1.442695, %v667_v45 }
 0x242   : >> { %1331 = vpow2.f32 %v671_v15  ;;  %v2067_v28 = vpop.permute.xlu1 %906 }
 0x243   : >> { %v915_v29 = vrot.slane %v2067_v28, %v629_v26  ;;  %v919_v30 = vrot.slane %v2067_v28, %v633_v31  ;;  %1333 = vpow2.f32 %v673_v27  ;;  %v923_v41 = vrot.slane %v2067_v28, %v637_v10 }
 0x244   : >> { %1335 = vpow2.f32 %v675_v7  ;;  %v931_v34 = vrot.slane %v2067_v28, %v645_v37  ;;  %v911_v26 = vrot.slane %v2067_v28, %v1824_v11  ;;  %v927_v5 = vrot.slane %v2067_v28, %v641_v16 }
 0x245   : >> { %v949_v40 = vsub.f32 %v1964_v4, %v915_v29  ;;  %v950_v1 = vsub.f32 %v1969_v23, %v919_v30  ;;  %v951_v36 = vsub.f32 %v2008_v38, %v923_v41  ;;  %v653_v4 = vsub.s32 7, %v1815_v6 }
 0x246   : >> { %v668_v23 = vsub.f32 %v1991_v17, %v646_v33  ;;  %v953_v8 = vsub.f32 %v2023_v47, %v931_v34  ;;  %v683_v47 = vmul.f32 1.442695, %v669_v55  ;;  %v948_v9 = vsub.f32 %v1962_v35, %v911_v26 }
 0x247   : >> { %v958_v43 = vmul.f32 1.442695, %v949_v40  ;;  %v960_v48 = vmul.f32 1.442695, %v950_v1  ;;  %v939_v53 = vrot.slane %v2067_v28, %v653_v4  ;;  %v962_v22 = vmul.f32 1.442695, %v951_v36 }
 0x248   : >> { %v654_v38 = vrot.slane %v622_v32, %v653_v4  ;;  %v681_v56 = vmul.f32 1.442695, %v668_v23  ;;  %v966_v57 = vmul.f32 1.442695, %v953_v8  ;;  %v935_v11 = vrot.slane %v2067_v28, %v649_v44 }
 0x249   : >> { %1337 = vpow2.f32 %v958_v43  ;;  %v955_v6 = vsub.f32 %v2035_v21, %v939_v53  ;;  %v952_v3 = vsub.f32 %v1982_v12, %v927_v5  ;;  %v956_v13 = vmul.f32 1.442695, %v948_v9 }
 0x24a   : >> { %1339 = vpow2.f32 %v677_v46  ;;  %v670_v61 = vsub.f32 %v2014_v42, %v654_v38  ;;  %v954_v19 = vsub.f32 %v2028_v49, %v935_v11 }
 0x24b   : >> { %1341 = vpow2.f32 %v960_v48  ;;  %v970_v31 = vmul.f32 1.442695, %v955_v6  ;;  %v964_v16 = vmul.f32 1.442695, %v952_v3 }
 0x24c   : >> { %v1332_v50 = vpop.eup %1331  ;;  %1343 = vpow2.f32 %v679_v52  ;;  %v685_v21 = vmul.f32 1.442695, %v670_v61  ;;  %v968_v27 = vmul.f32 1.442695, %v954_v19  ;;  %v616_v19 = vmul.f32 1.442695, %v615_v25 }
 0x24d   : >> { %696 = vperm.xlu1 %1328, %v1332_v50   ;;  %v1334_v54 = vpop.eup %1333  ;;  %1345 = vpow2.f32 %v962_v22 }
 0x24e   : >> { %v1336_v17 = vpop.eup %1335  ;;  %1347 = vpow2.f32 %v681_v56 }
 0x24f   : >> { %1349 = vpow2.f32 %v966_v57 }
 0x250   : >> { %1351 = vpow2.f32 %v683_v47 }
 0x251   : >> { %699 = vperm.xlu1 %1328, %v1334_v54   ;;  %1353 = vpow2.f32 %v970_v31 }
 0x252   : >> { %1355 = vpow2.f32 %v685_v21 }
 0x253   : >> { %v1338_v59 = vpop.eup %1337  ;;  %1357 = vpow2.f32 %v956_v13 }
 0x254   : >> { %984 = vperm.xlu0 %1327, %v1338_v59   ;;  %v1340_v18 = vpop.eup %1339  ;;  %1359 = vpow2.f32 %v964_v16  ;;  %v901_v16 = vmul.f32 1.442695, %v900_v63 }
 0x255   : >> { %702 = vperm.xlu1 %1328, %v1336_v17   ;;  %v1342_v32 = vpop.eup %1341  ;;  %1361 = vpow2.f32 %v968_v27 }
 0x256   : >> { %v1344_v42 = vpop.eup %1343  ;;  %1363 = vpow2.f32 %v616_v19 }
 0x257   : >> { %v1346_v10 = vpop.eup %1345  ;;  %1365 = vpow2.f32 %v901_v16 }
 0x258   : >> { %987 = vperm.xlu0 %1327, %v1342_v32   ;;  %v1348_v14 = vpop.eup %1347 }
 0x259   : >> { %705 = vperm.xlu1 %1328, %v1340_v18   ;;  %v1350_v15 = vpop.eup %1349 }
 0x25a   : >> { %v1352_v35 = vpop.eup %1351 }
 0x25b   : >> { %v1354_v20 = vpop.eup %1353 }
 0x25c   : >> { %990 = vperm.xlu0 %1327, %v1346_v10   ;;  %v1356_v29 = vpop.eup %1355 }
 0x25d   : >> { %708 = vperm.xlu1 %1328, %v1344_v42   ;;  %v1358_v12 = vpop.eup %1357 }
 0x25e   : >> { %v1360_v28 = vpop.eup %1359 }
 0x25f   : >> { %v1362_v30 = vpop.eup %1361 }
 0x260   : >> { %996 = vperm.xlu0 %1327, %v1350_v15  }
 0x261   : >> { %711 = vperm.xlu1 %1328, %v1348_v14  }
 0x264   : >> { %1002 = vperm.xlu0 %1327, %v1354_v20  }
 0x265   : >> { %714 = vperm.xlu1 %1328, %v1352_v35   ;;  %v275_v35 = vld [vmem:[%s274_s23] sm:$0xff] }
 0x269   : >> { %717 = vperm.xlu1 %1328, %v1356_v29  }
 0x26d   : >> { %981 = vperm.xlu1 %1328, %v1358_v12  }
 0x271   : >> { %993 = vperm.xlu1 %1328, %v1360_v28  }
 0x275   : >> { %999 = vperm.xlu1 %1328, %v1362_v30  }
 0x2cc   : >> { %v697_v37 = vpop.permute.xlu1 %696 }
 0x2cd   : >> { %v722_v33 = vrot.slane %v697_v37, %v1972_v24 }
 0x2d0   : >> { %v700_v49 = vpop.permute.xlu1 %699 }
 0x2d1   : >> { %v726_v1 = vrot.slane %v700_v49, %v1972_v24 }
 0x2d3   : >> { %v985_v7 = vpop.permute.xlu0 %984  ;;  %v751_v36 = vsel %vm595_vm1, %v726_v1, %v722_v33 }
 0x2d4   : >> { %v703_v39 = vpop.permute.xlu1 %702  ;;  %v1011_v6 = vrot.slane %v985_v7, %v1972_v24 }
 0x2d5   : >> { %v730_v44 = vrot.slane %v703_v39, %v1972_v24 }
 0x2d7   : >> { %v988_v43 = vpop.permute.xlu0 %987  ;;  %v752_v50 = vsel %vm597_vm2, %v730_v44, %v751_v36 }
 0x2d8   : >> { %v706_v0 = vpop.permute.xlu1 %705  ;;  %v1015_v59 = vrot.slane %v988_v43, %v1972_v24 }
 0x2d9   : >> { %v734_v45 = vrot.slane %v706_v0, %v1972_v24 }
 0x2db   : >> { %v753_v51 = vsel %vm599_vm3, %v734_v45, %v752_v50  ;;  %v991_v23 = vpop.permute.xlu0 %990 }
 0x2dc   : >> { %v709_v40 = vpop.permute.xlu1 %708  ;;  %v1019_v61 = vrot.slane %v991_v23, %v1972_v24 }
 0x2dd   : >> { %v738_v46 = vrot.slane %v709_v40, %v1972_v24 }
 0x2df   : >> { %v754_v52 = vsel %vm601_vm4, %v738_v46, %v753_v51  ;;  %v997_v57 = vpop.permute.xlu0 %996 }
 0x2e0   : >> { %v712_v41 = vpop.permute.xlu1 %711  ;;  %v1027_v9 = vrot.slane %v997_v57, %v1972_v24 }
 0x2e1   : >> { %v742_v48 = vrot.slane %v712_v41, %v1972_v24 }
 0x2e3   : >> { %v755_v8 = vsel %vm603_vm5, %v742_v48, %v754_v52  ;;  %v1003_v21 = vpop.permute.xlu0 %1002 }
 0x2e4   : >> { %v715_v34 = vpop.permute.xlu1 %714  ;;  %v1035_v11 = vrot.slane %v1003_v21, %v1972_v24 }
 0x2e5   : >> { %v746_v4 = vrot.slane %v715_v34, %v1972_v24 }
 0x2e7   : >> { %v756_v54 = vsel %vm605_vm6, %v746_v4, %v755_v8 }
 0x2e8   : >> { %v718_v53 = vpop.permute.xlu1 %717 }
 0x2e9   : >> { %v750_v22 = vrot.slane %v718_v53, %v1972_v24 }
 0x2eb   : >> { %v757_v38 = vsel %vm607_vm7, %v750_v22, %v756_v54 }
 0x2ec   : >> { %v982_v55 = vpop.permute.xlu1 %981  ;;  %v759_v56 = vsel %vm610_vm8, %v757_v38, 0.0 }
 0x2ed   : >> { %v1007_v17 = vrot.slane %v982_v55, %v1972_v24  ;;  %760 = vadd.xlane.f32.xlu1 %v759_v56 }
 0x2ef   : >> { %v1036_v47 = vsel %vm595_vm1, %v1011_v6, %v1007_v17 }
 0x2f0   : >> { %v1037_v26 = vsel %vm597_vm2, %v1015_v59, %v1036_v47  ;;  %v994_v31 = vpop.permute.xlu1 %993 }
 0x2f1   : >> { %v1038_v18 = vsel %vm599_vm3, %v1019_v61, %v1037_v26  ;;  %v1023_v32 = vrot.slane %v994_v31, %v1972_v24 }
 0x2f3   : >> { %v1039_v5 = vsel %vm601_vm4, %v1023_v32, %v1038_v18 }
 0x2f4   : >> { %v1000_v42 = vpop.permute.xlu1 %999  ;;  %v1040_v3 = vsel %vm603_vm5, %v1027_v9, %v1039_v5 }
 0x2f5   : >> { %v1031_v10 = vrot.slane %v1000_v42, %v1972_v24  ;;  %v1364_v24 = vpop.eup %1363 }
 0x2f6   : >> { %v618_v20 = vmul.f32 %v1364_v24, %v275_v35  ;;  %v1366_v12 = vpop.eup %1365 }
 0x2f7   : >> { %v1041_v13 = vsel %vm605_vm6, %v1031_v10, %v1040_v3 }
 0x2f8   : >> { %v1042_v14 = vsel %vm607_vm7, %v1035_v11, %v1041_v13 }
 0x2f9   : >> { %v1044_v15 = vsel %vm610_vm8, %v1042_v14, 0.0 }
 0x2fa   : >> { %1045 = vadd.xlane.f32.xlu0 %v1044_v15 }
 0x37a   : >> { %v761_v27 = vpop.xlane.xlu1 %760 }
 0x37b   : >> { %v762_v29 = vadd.f32 %v761_v27, %v618_v20 }
 0x37d   : >> { %v903_v28 = vmul.f32 %v1366_v12, %v762_v29 }
 0x384   : > { %262 = sbr.rel (!%p260_p8) target bundleno = 106 (0x6a), region = 105 }
 0x387   : >> { %v1046_v30 = vpop.xlane.xlu0 %1045 }
 0x388   : >> { %v1047_v37 = vadd.f32 %v1046_v30, %v903_v28 }
 0x38a   : >> { %1050 = vst.msk [vmem:[%s274_s23] sm:$0xff] %vm1048_vm9, %v1047_v37 }
 0x38b   : > { %1054 = sbr.rel (%p1205_p6) target bundleno = 931 (0x3a3), region = 55  ;;  %v1055_v62 = vld [vmem:[#allocation2] sm:$0xff] (!%p1205_p6)  ;;  %v1056_v39 = vld [vmem:[#allocation2 + $0x8] sm:$0xff] (!%p1205_p6) }
 0x391   : > { %v1057_v58 = vld [vmem:[#allocation3] sm:$0xff] (!%p1205_p6)  ;;  %v1058_v60 = vld [vmem:[#allocation3 + $0x8] sm:$0xff] (!%p1205_p6) }
 0x392   : > { %1367 = vlog2.f32 %v1057_v58 }
 0x393   : > { %1369 = vlog2.f32 %v1058_v60 }
 0x39c   : > { %v1368_v25 = vpop.eup %1367 }
 0x39d   : > { %v1370_v63 = vpop.eup %1369  ;;  %v1060_v49 = vmul.f32 0.6931472, %v1368_v25 }
 0x39e   : > { %v1062_v0 = vmul.f32 0.6931472, %v1370_v63 }
 0x39f   : > { %v1063_v7 = vadd.f32 %v1060_v49, %v1055_v62 }
 0x3a0   : > { %v1064_v40 = vadd.f32 %v1062_v0, %v1056_v39 }
 0x3a1   : > { %1066 = vst.msk [vmem:[%s1798_s26] sm:$0xff] %vm1048_vm9, %v1063_v7 }
 0x3a2   : > { %1067 = vst.msk [vmem:[%s1798_s26 + $0x8] sm:$0xff] %vm1048_vm9, %v1064_v40 }
 0x3a3 PF: > { %s19_s22 = sadd.s32 1, %s1529_s22   ;;  %s2201_s12 = smov %s1493_s13 }
 0x3a4   : > { %p16_p10 = scmp.ge.s32.totalorder %s19_s22, 6   ;;  %s2202_s13 = smov %s1497_s14 }
 0x3a5   : > { %s2203_s14 = smov %s1731_s6  ;;  %s2204_s15 = smov %s1505_s16 }
 0x3a6   : > { %s2205_s16 = smov %s1509_s17  ;;  %s2206_s17 = smov %s1651_s4 }
 0x3a7   : > { %s2207_s18 = smov %s1521_s20  ;;  %s2208_s19 = smov %s1525_s21 }
 0x3a8   : > { %s2209_s20 = smov %s2212_s24  ;;  %s2210_s21 = smov %s2216_s9 }
 0x3a9   :  { %18 = sbr.rel (!%p16_p10) target bundleno = 9 (0x9), region = 116 }
 0x3b0   :  { %1090 = vsyncpa [#allocation5], 1 }
 0x3b1   :  { %1092 = vsyncpa [#allocation5 + $0x1], 1 }
 0x3b2   :  { %1093 = vsyncpa [#allocation7], 1 }
 0x3b3   :  { %1095 = vsyncpa [#allocation7 + $0x1], 1 }

</bundles_post_ra>
